<compile_context>
chip_gen: v7x
topology: tpu7x:2x2x1
jax: 0.10.0
libtpu: 0.0.40
codegen_flags: <defaults>
</compile_context>

<pallas_src>
import jax
import jax.numpy as jnp
from jax import lax
from jax.experimental import pallas as pl
from jax.experimental.pallas import tpu as pltpu


def _round_up(x, m):
    return ((x + m - 1) // m) * m


# -----------------------------------------------------------------------------
# Kernel 1: robust normalization (per image), medians come in via scalar prefetch
# -----------------------------------------------------------------------------
def _normalize_kernel(m_p_ref, m_t_ref, p_ref, t_ref, msk_ref, op_ref, ot_ref):
    b = pl.program_id(0)
    m_p = m_p_ref[b]                       # per-image lower median of mask*pred (SMEM scalar)
    m_t = m_t_ref[b]

    p = p_ref[0].astype(jnp.float32)
    t = t_ref[0].astype(jnp.float32)
    msk = msk_ref[0].astype(jnp.float32)

    ssum = jnp.sum(msk)
    valid = ssum > 0.0
    safe_ssum = jnp.where(valid, ssum, 1.0)

    sp = p - m_p
    st = t - m_t
    s_p = jnp.where(valid, jnp.maximum(jnp.sum(msk * jnp.abs(sp)) / safe_ssum, 1e-6), 1.0)
    s_t = jnp.where(valid, jnp.maximum(jnp.sum(msk * jnp.abs(st)) / safe_ssum, 1e-6), 1.0)

    op_ref[0] = (sp / s_p).astype(op_ref.dtype)
    ot_ref[0] = (st / s_t).astype(ot_ref.dtype)


def _normalize_pair_pallas(prediction, target, mask, m_p, m_t):
    B, H, W = prediction.shape
    spec = pl.BlockSpec((1, H, W), lambda b, mp, mt: (b, 0, 0))
    return pl.pallas_call(
        _normalize_kernel,
        out_shape=(jax.ShapeDtypeStruct((B, H, W), jnp.float32),
                   jax.ShapeDtypeStruct((B, H, W), jnp.float32)),
        grid_spec=pltpu.PrefetchScalarGridSpec(
            num_scalar_prefetch=2,
            grid=(B,),
            in_specs=[spec, spec, spec],
            out_specs=[pl.BlockSpec((1, H, W), lambda b, mp, mt: (b, 0, 0)),
                       pl.BlockSpec((1, H, W), lambda b, mp, mt: (b, 0, 0))],
        ),
        compiler_params=pltpu.CompilerParams(dimension_semantics=("parallel",)),
    )(m_p, m_t, prediction, target, mask)


# -----------------------------------------------------------------------------
# Kernel 2: data loss ("trimmed" MAE, batch-based) as a lane-dense streaming reduction
# -----------------------------------------------------------------------------
def _data_loss_kernel(p_ref, t_ref, m_ref, out_ref, num_acc, den_acc):
    i = pl.program_id(0)

    @pl.when(i == 0)
    def _():
        num_acc[...] = jnp.zeros_like(num_acc)
        den_acc[...] = jnp.zeros_like(den_acc)

    p = p_ref[...].astype(jnp.float32)
    t = t_ref[...].astype(jnp.float32)
    msk = m_ref[...].astype(jnp.float32)

    absres = jnp.where(msk != 0.0, jnp.abs(p - t), 0.0)
    tm, lanes = absres.shape
    # vreg-shaped accumulation: only VALU adds per step, cross-lane reduce deferred to the end
    num_acc[...] += jnp.sum(absres.reshape(tm // 8, 8, lanes), axis=0)
    den_acc[...] += jnp.sum(msk.reshape(tm // 8, 8, lanes), axis=0)

    @pl.when(i == pl.num_programs(0) - 1)
    def _():
        num = jnp.sum(num_acc[...])
        den = jnp.sum(den_acc[...])
        out_ref[0, 0] = jnp.where(den == 0.0, 0.0, num / (2.0 * den))


def _data_loss_pallas(p, t, m):
    B, H, W = p.shape
    total = B * H * W
    LANES = 128
    rows = -(-total // LANES)
    TM = min(512, _round_up(rows, 8))            # big row tiles, multiple of 8; < 1 MiB/input/buffer
    n_blocks = -(-rows // TM)
    padded_rows = n_blocks * TM
    pad = padded_rows * LANES - total

    def prep(x):
        xf = x.reshape(-1)
        if pad:
            xf = jnp.pad(xf, (0, pad))
        return xf.reshape(padded_rows, LANES)

    pf, tf, mf = prep(p), prep(t), prep(m)
    itemsize = jnp.dtype(p.dtype).itemsize

    out = pl.pallas_call(
        _data_loss_kernel,
        out_shape=jax.ShapeDtypeStruct((1, 1), jnp.float32),
        grid_spec=pltpu.PrefetchScalarGridSpec(
            num_scalar_prefetch=0,
            grid=(n_blocks,),
            in_specs=[pl.BlockSpec((TM, LANES), lambda i: (i, 0))] * 3,
            out_specs=pl.BlockSpec((1, 1), lambda i: (0, 0)),
            scratch_shapes=[pltpu.VMEM((8, 128), jnp.float32),
                            pltpu.VMEM((8, 128), jnp.float32)],
        ),
        compiler_params=pltpu.CompilerParams(dimension_semantics=("arbitrary",)),
        cost_estimate=pl.CostEstimate(flops=4 * total, transcendentals=0,
                                      bytes_accessed=3 * total * int(itemsize)),
    )(pf, tf, mf)
    return out[0, 0]


# -----------------------------------------------------------------------------
# Kernel 3: gradient loss at one scale (batch-based reduction)
# -----------------------------------------------------------------------------
def _gradient_loss_kernel(p_ref, t_ref, m_ref, out_ref, num_acc, den_acc):
    b = pl.program_id(0)

    @pl.when(b == 0)
    def _():
        num_acc[...] = jnp.zeros_like(num_acc)
        den_acc[...] = jnp.zeros_like(den_acc)

    p = p_ref[0].astype(jnp.float32)
    t = t_ref[0].astype(jnp.float32)
    msk = m_ref[0].astype(jnp.float32)
    H, W = p.shape

    d = msk * (p - t)

    # forward-neighbour differences via lane/sublane rotation; the wrap-around
    # pair is masked with a 2-D iota (padding columns/rows carry mask == 0).
    d_right = pltpu.roll(d, W - 1, axis=1)       # d_right[:, j] = d[:, (j + 1) % W]
    m_right = pltpu.roll(msk, W - 1, axis=1)
    col = lax.broadcasted_iota(jnp.int32, (H, W), 1)
    gx = jnp.abs(d_right - d) * m_right * msk
    gx = jnp.where(col < W - 1, gx, 0.0)

    d_down = pltpu.roll(d, H - 1, axis=0)        # d_down[i, :] = d[(i + 1) % H, :]
    m_down = pltpu.roll(msk, H - 1, axis=0)
    row = lax.broadcasted_iota(jnp.int32, (H, W), 0)
    gy = jnp.abs(d_down - d) * m_down * msk
    gy = jnp.where(row < H - 1, gy, 0.0)

    num_acc[0, 0] += jnp.sum(gx) + jnp.sum(gy)
    den_acc[0, 0] += jnp.sum(msk)

    @pl.when(b == pl.num_programs(0) - 1)
    def _():
        den = den_acc[0, 0]
        out_ref[0, 0] = jnp.where(den == 0.0, 0.0, num_acc[0, 0] / den)


def _gradient_loss_scale_pallas(p, t, m):
    B, H, W = p.shape
    Hp, Wp = _round_up(H, 8), _round_up(W, 128)
    if (Hp, Wp) != (H, W):
        cfg = ((0, 0), (0, Hp - H), (0, Wp - W))
        p = jnp.pad(p, cfg)
        t = jnp.pad(t, cfg)
        m = jnp.pad(m, cfg)          # zero mask on padding keeps the math exact

    out = pl.pallas_call(
        _gradient_loss_kernel,
        out_shape=jax.ShapeDtypeStruct((1, 1), jnp.float32),
        grid_spec=pltpu.PrefetchScalarGridSpec(
            num_scalar_prefetch=0,
            grid=(B,),
            in_specs=[pl.BlockSpec((1, Hp, Wp), lambda b: (b, 0, 0))] * 3,
            out_specs=pl.BlockSpec((1, 1), lambda b: (0, 0)),
            scratch_shapes=[pltpu.VMEM((1, 1), jnp.float32),
                            pltpu.VMEM((1, 1), jnp.float32)],
        ),
        compiler_params=pltpu.CompilerParams(dimension_semantics=("arbitrary",)),
    )(p, t, m)
    return out[0, 0]


# -----------------------------------------------------------------------------
# Top-level: TrimmedProcrustesLoss.forward
# -----------------------------------------------------------------------------
def trimmed_procrustes_loss_pallas(prediction, target, mask, alpha=0.5, scales=4):
    if prediction.ndim == 4:
        prediction = jnp.squeeze(prediction, axis=1)
        target = jnp.squeeze(target, axis=1)
        mask = jnp.squeeze(mask, axis=1)
    assert prediction.ndim == 3, prediction.shape
    B = prediction.shape[0]

    # TODO(synk): the per-image robust shift is torch.median (lower median) of mask*x,
    # which needs a sort -- no clean Pallas TPU equivalent, so it is computed with
    # jnp.sort here and fed to the normalization kernel via scalar prefetch (SMEM).
    def lower_median(x):
        flat = (mask.astype(jnp.float32) * x.astype(jnp.float32)).reshape(B, -1)
        n = flat.shape[1]
        return jnp.sort(flat, axis=1)[:, (n - 1) // 2]

    m_p = lower_median(prediction)
    m_t = lower_median(target)

    pred_n, tgt_n = _normalize_pair_pallas(prediction, target, mask, m_p, m_t)

    data_loss = _data_loss_pallas(pred_n, tgt_n, mask)

    reg = jnp.float32(0.0)
    for s in range(scales):
        step = 2 ** s
        reg = reg + _gradient_loss_scale_pallas(
            pred_n[:, ::step, ::step], tgt_n[:, ::step, ::step], mask[:, ::step, ::step])

    return data_loss, jnp.float32(alpha) * reg


# -----------------------------------------------------------------------------
# Pure-JAX reference mirroring the PyTorch module (for the self-check)
# -----------------------------------------------------------------------------
def trimmed_procrustes_loss_ref(prediction, target, mask, alpha=0.5, scales=4):
    if prediction.ndim == 4:
        prediction = jnp.squeeze(prediction, axis=1)
        target = jnp.squeeze(target, axis=1)
        mask = jnp.squeeze(mask, axis=1)

    def normalize(x, m):
        ssum = jnp.sum(m, axis=(1, 2))
        valid = ssum > 0
        flat = (m * x).reshape(x.shape[0], -1)
        n = flat.shape[1]
        med = jnp.sort(flat, axis=1)[:, (n - 1) // 2]       # torch.median = lower median
        shift = jnp.where(valid, med, 0.0)
        x = x - shift[:, None, None]
        sq = jnp.sum(m * jnp.abs(x), axis=(1, 2))
        s = jnp.where(valid, jnp.maximum(sq / jnp.where(valid, ssum, 1.0), 1e-6), 1.0)
        return x / s[:, None, None]

    p = normalize(prediction.astype(jnp.float32), mask.astype(jnp.float32))
    t = normalize(target.astype(jnp.float32), mask.astype(jnp.float32))

    # trimmed_mae_loss: the tuple-slicing in the reference means no trimming happens.
    M = jnp.sum(mask, axis=(1, 2))
    res = jnp.where(mask != 0, jnp.abs(p - t), 0.0)
    data = jnp.sum(res) / (2.0 * jnp.sum(M))

    def grad_loss(pp, tt, mm):
        Mg = jnp.sum(mm, axis=(1, 2))
        d = mm * (pp - tt)
        gx = jnp.abs(d[:, :, 1:] - d[:, :, :-1]) * mm[:, :, 1:] * mm[:, :, :-1]
        gy = jnp.abs(d[:, 1:, :] - d[:, :-1, :]) * mm[:, 1:, :] * mm[:, :-1, :]
        il = jnp.sum(gx, axis=(1, 2)) + jnp.sum(gy, axis=(1, 2))
        tot = jnp.sum(Mg)
        return jnp.where(tot == 0, 0.0, jnp.sum(il) / tot)

    reg = 0.0
    for s in range(scales):
        step = 2 ** s
        reg = reg + grad_loss(p[:, ::step, ::step], t[:, ::step, ::step],
                              mask[:, ::step, ::step])
    return data, alpha * reg


if __name__ == "__main__":
    key = jax.random.PRNGKey(0)
    k1, k2, k3 = jax.random.split(key, 3)

    B, H, W = 2, 32, 32
    prediction = jax.random.normal(k1, (B, 1, H, W), dtype=jnp.float32) + 2.0
    target = 0.5 * jax.random.normal(k2, (B, 1, H, W), dtype=jnp.float32) + 1.5
    mask = (jax.random.uniform(k3, (B, 1, H, W)) < 0.7).astype(jnp.float32)

    data_loss, reg_loss = trimmed_procrustes_loss_pallas(prediction, target, mask)
    jax.block_until_ready((data_loss, reg_loss))

    d_ref, r_ref = trimmed_procrustes_loss_ref(prediction, target, mask)
    assert jnp.allclose(data_loss, d_ref, rtol=1e-4, atol=1e-5), (data_loss, d_ref)
    assert jnp.allclose(reg_loss, r_ref, rtol=1e-4, atol=1e-5), (reg_loss, r_ref)

    print("KERNEL_OK")
</pallas_src>

<mosaic_0001>
module attributes {stable_mosaic.version = 11 : i64} {
  func.func @_normalize_kernel(%arg0: i32, %arg1: memref<2xf32, #tpu.memory_space<smem>>, %arg2: memref<2xf32, #tpu.memory_space<smem>>, %arg3: memref<1x32x32xf32, #tpu.memory_space<vmem>>, %arg4: memref<1x32x32xf32, #tpu.memory_space<vmem>>, %arg5: memref<1x32x32xf32, #tpu.memory_space<vmem>>, %arg6: memref<1x32x32xf32, #tpu.memory_space<vmem>>, %arg7: memref<1x32x32xf32, #tpu.memory_space<vmem>>) attributes {dimension_semantics = [#tpu.dimension_semantics<parallel>], iteration_bounds = array<i64: 2>, scalar_prefetch = 2 : i64, scratch_operands = 0 : i64, tpu.core_type = #tpu.core_type<tc>, window_params = [{transform_indices = @transform_0, window_bounds = array<i64: 1, 32, 32>}, {transform_indices = @transform_1, window_bounds = array<i64: 1, 32, 32>}, {transform_indices = @transform_2, window_bounds = array<i64: 1, 32, 32>}, {transform_indices = @transform_3, window_bounds = array<i64: 1, 32, 32>}, {transform_indices = @transform_4, window_bounds = array<i64: 1, 32, 32>}]} {
    %0 = arith.index_cast %arg0 : i32 to index
    %1 = memref.load %arg1[%0] : memref<2xf32, #tpu.memory_space<smem>>
    %2 = arith.index_cast %arg0 : i32 to index
    %3 = memref.load %arg2[%2] : memref<2xf32, #tpu.memory_space<smem>>
    %c0 = arith.constant 0 : index
    %c0_0 = arith.constant 0 : index
    %c0_1 = arith.constant 0 : index
    %4 = vector.load %arg3[%c0, %c0_0, %c0_1] : memref<1x32x32xf32, #tpu.memory_space<vmem>>, vector<1x32x32xf32>
    %5 = vector.shape_cast %4 : vector<1x32x32xf32> to vector<32x32xf32>
    %c0_2 = arith.constant 0 : index
    %c0_3 = arith.constant 0 : index
    %c0_4 = arith.constant 0 : index
    %6 = vector.load %arg4[%c0_2, %c0_3, %c0_4] : memref<1x32x32xf32, #tpu.memory_space<vmem>>, vector<1x32x32xf32>
    %7 = vector.shape_cast %6 : vector<1x32x32xf32> to vector<32x32xf32>
    %c0_5 = arith.constant 0 : index
    %c0_6 = arith.constant 0 : index
    %c0_7 = arith.constant 0 : index
    %8 = vector.load %arg5[%c0_5, %c0_6, %c0_7] : memref<1x32x32xf32, #tpu.memory_space<vmem>>, vector<1x32x32xf32>
    %9 = vector.shape_cast %8 : vector<1x32x32xf32> to vector<32x32xf32>
    %10 = vector.shape_cast %9 : vector<32x32xf32> to vector<1x32x32xf32>
    %cst = arith.constant dense<0.000000e+00> : vector<1xf32>
    %11 = vector.multi_reduction <add>, %10, %cst [1, 2] : vector<1x32x32xf32> to vector<1xf32>
    %12 = vector.shape_cast %11 : vector<1xf32> to vector<1x1x1xf32>
    %13 = vector.extract %12[0, 0, 0] : f32 from vector<1x1x1xf32>
    %cst_8 = arith.constant 0.000000e+00 : f32
    %14 = arith.cmpf ogt, %13, %cst_8 : f32
    %cst_9 = arith.constant 1.000000e+00 : f32
    %15 = arith.select %14, %13, %cst_9 : f32
    %16 = vector.broadcast %1 : f32 to vector<32x32xf32>
    %17 = arith.subf %5, %16 : vector<32x32xf32>
    %18 = vector.broadcast %3 : f32 to vector<32x32xf32>
    %19 = arith.subf %7, %18 : vector<32x32xf32>
    %20 = math.absf %17 : vector<32x32xf32>
    %21 = arith.mulf %9, %20 : vector<32x32xf32>
    %22 = vector.shape_cast %21 : vector<32x32xf32> to vector<1x32x32xf32>
    %cst_10 = arith.constant dense<0.000000e+00> : vector<1xf32>
    %23 = vector.multi_reduction <add>, %22, %cst_10 [1, 2] : vector<1x32x32xf32> to vector<1xf32>
    %24 = vector.shape_cast %23 : vector<1xf32> to vector<1x1x1xf32>
    %25 = vector.extract %24[0, 0, 0] : f32 from vector<1x1x1xf32>
    %26 = arith.divf %25, %15 : f32
    %cst_11 = arith.constant 9.99999997E-7 : f32
    %27 = arith.maximumf %26, %cst_11 : f32
    %cst_12 = arith.constant 1.000000e+00 : f32
    %28 = arith.select %14, %27, %cst_12 : f32
    %29 = math.absf %19 : vector<32x32xf32>
    %30 = arith.mulf %9, %29 : vector<32x32xf32>
    %31 = vector.shape_cast %30 : vector<32x32xf32> to vector<1x32x32xf32>
    %cst_13 = arith.constant dense<0.000000e+00> : vector<1xf32>
    %32 = vector.multi_reduction <add>, %31, %cst_13 [1, 2] : vector<1x32x32xf32> to vector<1xf32>
    %33 = vector.shape_cast %32 : vector<1xf32> to vector<1x1x1xf32>
    %34 = vector.extract %33[0, 0, 0] : f32 from vector<1x1x1xf32>
    %35 = arith.divf %34, %15 : f32
    %cst_14 = arith.constant 9.99999997E-7 : f32
    %36 = arith.maximumf %35, %cst_14 : f32
    %cst_15 = arith.constant 1.000000e+00 : f32
    %37 = arith.select %14, %36, %cst_15 : f32
    %38 = vector.broadcast %28 : f32 to vector<32x32xf32>
    %39 = arith.divf %17, %38 : vector<32x32xf32>
    %c0_16 = arith.constant 0 : index
    %c0_17 = arith.constant 0 : index
    %c0_18 = arith.constant 0 : index
    %40 = vector.load %arg6[%c0_16, %c0_17, %c0_18] : memref<1x32x32xf32, #tpu.memory_space<vmem>>, vector<1x32x32xf32>
    %41 = vector.shape_cast %40 : vector<1x32x32xf32> to vector<32x32xf32>
    %42 = vector.shape_cast %39 : vector<32x32xf32> to vector<1x32x32xf32>
    tpu.vector_store %arg6[%c0_16, %c0_17, %c0_18], %42 {strides = array<i32>} : memref<1x32x32xf32, #tpu.memory_space<vmem>>, vector<1x32x32xf32>,
    %43 = vector.broadcast %37 : f32 to vector<32x32xf32>
    %44 = arith.divf %19, %43 : vector<32x32xf32>
    %c0_19 = arith.constant 0 : index
    %c0_20 = arith.constant 0 : index
    %c0_21 = arith.constant 0 : index
    %45 = vector.load %arg7[%c0_19, %c0_20, %c0_21] : memref<1x32x32xf32, #tpu.memory_space<vmem>>, vector<1x32x32xf32>
    %46 = vector.shape_cast %45 : vector<1x32x32xf32> to vector<32x32xf32>
    %47 = vector.shape_cast %44 : vector<32x32xf32> to vector<1x32x32xf32>
    tpu.vector_store %arg7[%c0_19, %c0_20, %c0_21], %47 {strides = array<i32>} : memref<1x32x32xf32, #tpu.memory_space<vmem>>, vector<1x32x32xf32>,
    return
  }
  func.func @transform_0(%arg0: i32, %arg1: memref<2xf32, #tpu.memory_space<smem>>, %arg2: memref<2xf32, #tpu.memory_space<smem>>) -> (i32, i32, i32) {
    %c0_i32 = arith.constant 0 : i32
    %c0_i32_0 = arith.constant 0 : i32
    %c0_i32_1 = arith.constant 0 : i32
    return %arg0, %c0_i32, %c0_i32_0 : i32, i32, i32
  }
  func.func @transform_1(%arg0: i32, %arg1: memref<2xf32, #tpu.memory_space<smem>>, %arg2: memref<2xf32, #tpu.memory_space<smem>>) -> (i32, i32, i32) {
    %c0_i32 = arith.constant 0 : i32
    %c0_i32_0 = arith.constant 0 : i32
    %c0_i32_1 = arith.constant 0 : i32
    return %arg0, %c0_i32, %c0_i32_0 : i32, i32, i32
  }
  func.func @transform_2(%arg0: i32, %arg1: memref<2xf32, #tpu.memory_space<smem>>, %arg2: memref<2xf32, #tpu.memory_space<smem>>) -> (i32, i32, i32) {
    %c0_i32 = arith.constant 0 : i32
    %c0_i32_0 = arith.constant 0 : i32
    %c0_i32_1 = arith.constant 0 : i32
    return %arg0, %c0_i32, %c0_i32_0 : i32, i32, i32
  }
  func.func @transform_3(%arg0: i32, %arg1: memref<2xf32, #tpu.memory_space<smem>>, %arg2: memref<2xf32, #tpu.memory_space<smem>>) -> (i32, i32, i32) {
    %c0_i32 = arith.constant 0 : i32
    %c0_i32_0 = arith.constant 0 : i32
    %c0_i32_1 = arith.constant 0 : i32
    return %arg0, %c0_i32, %c0_i32_0 : i32, i32, i32
  }
  func.func @transform_4(%arg0: i32, %arg1: memref<2xf32, #tpu.memory_space<smem>>, %arg2: memref<2xf32, #tpu.memory_space<smem>>) -> (i32, i32, i32) {
    %c0_i32 = arith.constant 0 : i32
    %c0_i32_0 = arith.constant 0 : i32
    %c0_i32_1 = arith.constant 0 : i32
    return %arg0, %c0_i32, %c0_i32_0 : i32, i32, i32
  }
}

</mosaic_0001>

<bundles_post_ra>
// kernel: tpu_custom_call.1
= control target key start
LH: loop header
LB: loop body
LE: loop exit
PB: predicated region body
PF: predicated region fallthrough
CT: control target
= control target key end

     0   :  { %s1382_s0 = inlined_call_operand.hbm [shape: f32[2], index: 0, kind: input, shape index: {}]   ;;  %s1383_s2 = inlined_call_operand.hbm [shape: f32[2,32,32], index: 2, kind: input, shape index: {}]   ;;  %s1384_s3 = inlined_call_operand.hbm [shape: f32[2,32,32], index: 3, kind: input, shape index: {}]   ;;  %s1385_s4 = inlined_call_operand.hbm [shape: f32[2,32,32], index: 4, kind: input, shape index: {}]   ;;  %s1386_s5 = inlined_call_operand.hbm [shape: f32[2,32,32], index: 5, kind: output, shape index: {0}]   ;;  %s1387_s6 = inlined_call_operand.hbm [shape: f32[2,32,32], index: 6, kind: output, shape index: {1}]   ;;  %s1388_s1 = inlined_call_operand.vmem [shape: f32[2], index: 1, kind: input, shape index: {}]  }
   0x1   :  { %1395 = sst [smem:[#allocation19_spill]] %s1383_s2  ;;  %s733_s23 = scalar_lea.hbm %s1382_s0, 16 }
   0x2   :  { %1396 = sst [smem:[#allocation20_spill]] %s1384_s3  ;;  %p734_p0 = scmp.ne.s32.totalorder %s1382_s0, %s733_s23 }
   0x3   :  { %p737_p1 = scmp.lt.u32.totalorder %s733_s23, %s1382_s0 }
   0x5   :  { %p739_p2 = pnand %p737_p1, %p734_p0 }
   0x7   :  { %742 = shalt.err (!%p739_p2)  }
   0x8   :  { %s951_s28 = smov [#allocation3]   ;;  %s14_s9 = sshll.u32 %s1388_s1, 4  ;;  %s15_s9 = int_to_ptr.vmem [resolvable:$true] %s14_s9 }
   0x9   :  { %13 = dma.hbm_to_smem %s1382_s0, 16, %s951_s28, [#allocation2] }
   0xa   :  { %s743_s10 = scalar_lea.vmem %s15_s9, 16  ;;  %p748_p4 = scmp.lt.s32.totalorder %s15_s9, %s15_s9 }
   0xb   :  { %p744_p3 = scmp.ne.s32.totalorder %s15_s9, %s743_s10  ;;  %p749_p5 = scmp.lt.s32.totalorder %s743_s10, %s743_s10 }
   0xd   :  { %p750_p6 = por %p749_p5, %p748_p4 }
   0xf   :  { %p751_p7 = pnand %p750_p6, %p744_p3 }
  0x11   :  { %754 = shalt.err (!%p751_p7)  }
  0x12   :  { %s952_s11 = smov [#allocation4]  }
  0x13   :  { %17 = dma.vmem_to_smem %s15_s9, 16, %s952_s11, [#allocation2] }
  0x14   :  { %917 = dma.done.wait [#allocation2], 32 }
  0x15   :  { %918 = vsyncadd [#allocation2], 4294967264 }
  0x16   :  { %19 = sfence }
  0x17   :  { %20 = vsyncpa [#allocation6], 0 }
  0x18   :  { %22 = vsyncpa [#allocation6 + $0x1], 0 }
  0x19   :  { %23 = vsyncpa [#allocation9], 0 }
  0x1a   :  { %25 = vsyncpa [#allocation9 + $0x1], 0 }
  0x1b   :  { %26 = vsyncpa [#allocation7], 0 }
  0x1c   :  { %28 = vsyncpa [#allocation7 + $0x1], 0 }
  0x1d   :  { %29 = vsyncpa [#allocation13], 0 }
  0x1e   :  { %31 = vsyncpa [#allocation13 + $0x1], 0  ;;  %s1013_s0 = smov 0   ;;  %s1015_s1 = smov 0  }
  0x1f   :  { %s1017_s12 = smov 0   ;;  %s1019_s13 = smov 0  }
  0x20 LB: > { %s1034_s14 = sadd.s32 4294967295, %s949_s13   ;;  %s620_s15 = sadd.s32 4294967294, %s949_s13   ;;  %s949_s13 = sphi %s1019_s13, %s1416_s13   ;;  %s945_s12 = sphi %s1017_s12, %s1415_s12   ;;  %s941_s1 = sphi %s1015_s1, %s1414_s1   ;;  %s937_s0 = sphi %s1013_s0, %s1413_s0  }
  0x21   : > { %s1038_s16 = sadd.s32 1, %s949_s13   ;;  %s44_s17 = sadd.s32 1, %s945_s12 }
  0x22   : > { %s41_s18 = ssub.s32 %s949_s13, %s1038_s16  ;;  %p51_p8 = scmp.ne.s32.totalorder %s945_s12, %s941_s1 }
  0x23   : > { %p42_p9 = scmp.eq.s32.totalorder %s41_s18, 0  ;;  %p52_p10 = scmp.eq.s32.totalorder %s949_s13, 0 }
  0x24   : > { %p57_p11 = scmp.ne.s32.totalorder %s941_s1, %s937_s0  ;;  %p58_p12 = scmp.eq.s32.totalorder %s1034_s14, 0 }
  0x25   : > { %s1050_s19 = scalar_select %p42_p9, %s945_s12, %s44_s17  }
  0x26   : > { %p53_p13 = por %p52_p10, %p51_p8  ;;  %p1052_p0 = por %p58_p12, %p57_p11 }
  0x27   : > { %p133_p1 = scmp.eq.s32.totalorder %s1034_s14, 1  ;;  %p139_p2 = scmp.eq.s32.totalorder %s620_s15, 1 }
  0x28   : > { %s1397_s20 = scalar_select %p1052_p0, 1, 0 }
  0x29   : > { %p686_p4 = scmp.lt.s32.totalorder %s949_s13, 2  ;;  %p1059_p5 = por %p133_p1, %p51_p8 }
  0x2a   : > { %p1063_p6 = por %p139_p2, %p57_p11  ;;  %s185_s23 = sand.u32 1, %s945_s12  }
  0x2b   : > { %s1398_s21 = scalar_select %p1059_p5, 1, 0 }
  0x2c   : > { %s1399_s22 = scalar_select %p1063_p6, 1, 0 }
  0x2d   : > { %s1069_s24 = sshll.u32 %s949_s13, 9  ;;  %s1073_s25 = sshll.u32 %s185_s23, 5 }
  0x2e   : > { %p1075_p7 = pnand %p686_p4, %p53_p13  ;;  %s206_s27 = sand.u32 1, %s949_s13  }
  0x2f   : > { %s1401_s3 = sld [smem:[#allocation20_spill]]  ;;  %s210_s7 = scalar_lea.vmem [#allocation8], %s1073_s25 }
  0x30   : > { %s217_s8 = sshll.u32 %s210_s7, 4  ;;  %s1090_s9 = scalar_lea.sflag [#allocation9], %s206_s27  ;;  %s1087_s8 = int_to_ptr.vmem [resolvable:$true] %s217_s8 }
  0x31   : > { %p1096_p10 = pneg %p1075_p7 }
  0x35   : > { %s1084_s30 = scalar_lea.hbm %s1401_s3, %s1069_s24  ;;  %s760_s18 = scalar_lea.hbm %s1401_s3, 1024 }
  0x36   : > { %s755_s10 = scalar_lea.hbm %s1084_s30, 512  ;;  %p761_p13 = scmp.lt.u32.totalorder %s1084_s30, %s1401_s3 }
  0x37   : > { %p756_p9 = scmp.ne.s32.totalorder %s1084_s30, %s755_s10  ;;  %p762_p1 = scmp.lt.u32.totalorder %s760_s18, %s755_s10 }
  0x38   : > { %p764_p4 = scmp.lt.u32.totalorder %s755_s10, %s1084_s30 }
  0x39   : > { %p758_p11 = pnand %p1096_p10, %p756_p9  ;;  %p763_p2 = por %p762_p1, %p761_p13 }
  0x3b   : > { %p759_p12 = pneg %p758_p11  ;;  %p765_p3 = por %p764_p4, %p763_p2 }
  0x3d   : > { %p766_p8 = pnand %p765_p3, %p759_p12 }
  0x3f   : > { %769 = shalt.err (!%p766_p8)
}
  0x40   : > { %s770_s27 = scalar_lea.vmem %s1087_s8, 512  ;;  %s953_s7 = smov [#allocation8]  }
  0x41   : > { %p771_p9 = scmp.ne.s32.totalorder %s1087_s8, %s770_s27  ;;  %s775_s15 = sshll.u32 %s953_s7, 4  ;;  %s776_s15 = int_to_ptr.vmem [resolvable:$false] %s775_s15 }
  0x42   : > { %s777_s17 = scalar_lea.vmem %s776_s15, 1024  ;;  %p778_p5 = scmp.lt.s32.totalorder %s1087_s8, %s776_s15 }
  0x43   : > { %p773_p11 = pnand %p771_p9, %p1096_p10  ;;  %p779_p0 = scmp.lt.s32.totalorder %s777_s17, %s770_s27 }
  0x45   : > { %p774_p6 = pneg %p773_p11  ;;  %p780_p13 = por %p779_p0, %p778_p5 }
  0x47   : > { %p781_p1 = pnand %p780_p13, %p774_p6 }
  0x49   : > { %784 = shalt.err (!%p781_p1)
}
  0x4a   : > { %s1391_s10 = smov 128   ;;  %s1393_s18 = smov 8  }
  0x4b   : > { %675 = dma.hbm_to_vmem [thread:$0]  (!%p1075_p7), %s1084_s30, 512, %s1087_s8, %s1090_s9, %s1391_s10, %s1391_s10, %s1393_s18  }
  0x4c   : > { %p246_p0 = scmp.lt.s32.totalorder %s949_s13, 3  ;;  %s1403_s2 = sld [smem:[#allocation19_spill]] }
  0x4d   : > { %p1404_p3 = scmp.ge.s32.totalorder %s949_s13, 1  ;;  %s189_s15 = scalar_lea.vmem [#allocation5], %s1073_s25 }
  0x4e   : > { %s196_s17 = sshll.u32 %s189_s15, 4  ;;  %s1141_s30 = scalar_lea.sflag [#allocation6], %s185_s23  ;;  %s1137_s17 = int_to_ptr.vmem [resolvable:$true] %s196_s17 }
  0x4f   : > { %p1132_p5 = pnand %p1404_p3, %p246_p0 }
  0x51   : > { %s1405_s7 = scalar_select %p1132_p5, 1, 0 }
  0x52   : > { %s1128_s27 = scalar_lea.hbm %s1403_s2, %s1069_s24  ;;  %s790_s10 = scalar_lea.hbm %s1403_s2, 1024 }
  0x53   : > { %s785_s8 = scalar_lea.hbm %s1128_s27, 512  ;;  %p791_p2 = scmp.lt.u32.totalorder %s1128_s27, %s1403_s2 }
  0x54   : > { %p786_p6 = scmp.ne.s32.totalorder %s1128_s27, %s785_s8  ;;  %p792_p4 = scmp.lt.u32.totalorder %s790_s10, %s785_s8 }
  0x55   : > { %p794_p11 = scmp.lt.u32.totalorder %s785_s8, %s1128_s27 }
  0x56   : > { %p788_p8 = pnand %p786_p6, %p1096_p10  ;;  %p793_p9 = por %p792_p4, %p791_p2 }
  0x58   : > { %p789_p12 = pneg %p788_p8  ;;  %p795_p13 = por %p794_p11, %p793_p9 }
  0x5a   : > { %p796_p1 = pnand %p795_p13, %p789_p12 }
  0x5c   : > { %799 = shalt.err (!%p796_p1)
}
  0x5d   : > { %s800_s23 = scalar_lea.vmem %s1137_s17, 512  ;;  %s956_s15 = smov [#allocation5]  }
  0x5e   : > { %p801_p0 = scmp.ne.s32.totalorder %s1137_s17, %s800_s23  ;;  %s805_s28 = sshll.u32 %s956_s15, 4  ;;  %s806_s28 = int_to_ptr.vmem [resolvable:$false] %s805_s28 }
  0x5f   : > { %s807_s3 = scalar_lea.vmem %s806_s28, 1024  ;;  %p808_p8 = scmp.lt.s32.totalorder %s1137_s17, %s806_s28 }
  0x60   : > { %p803_p3 = pnand %p801_p0, %p1096_p10  ;;  %p809_p5 = scmp.lt.s32.totalorder %s807_s3, %s800_s23 }
  0x62   : > { %p804_p6 = pneg %p803_p3  ;;  %p810_p2 = por %p809_p5, %p808_p8 }
  0x64   : > { %p811_p4 = pnand %p810_p2, %p804_p6 }
  0x66   : > { %814 = shalt.err (!%p811_p4)
}
  0x67   : > { %s1406_s10 = smov 8   ;;  %s1407_s18 = smov 128  }
  0x68   : > { %672 = dma.hbm_to_vmem [thread:$0]  (!%p1075_p7), %s1128_s27, 512, %s1137_s17, %s1141_s30, %s1407_s18, %s1407_s18, %s1406_s10  }
  0x69   : > { %s1172_s15 = scalar_lea.hbm %s1385_s4, %s1069_s24  ;;  %s231_s23 = scalar_lea.vmem [#allocation10], %s1073_s25 }
  0x6a   : > { %s238_s28 = sshll.u32 %s231_s23, 4  ;;  %s815_s3 = scalar_lea.hbm %s1172_s15, 512  ;;  %s1175_s28 = int_to_ptr.vmem [resolvable:$true] %s238_s28 }
  0x6b   : > { %p816_p5 = scmp.ne.s32.totalorder %s1172_s15, %s815_s3  ;;  %s820_s17 = scalar_lea.hbm %s1385_s4, 1024 }
  0x6c   : > { %p821_p11 = scmp.lt.u32.totalorder %s1172_s15, %s1385_s4  ;;  %p822_p13 = scmp.lt.u32.totalorder %s820_s17, %s815_s3 }
  0x6d   : > { %p818_p12 = pnand %p816_p5, %p1096_p10  ;;  %p824_p0 = scmp.lt.u32.totalorder %s815_s3, %s1172_s15 }
  0x6e   : > { %p823_p1 = por %p822_p13, %p821_p11 }
  0x6f   : > { %p819_p9 = pneg %p818_p12 }
  0x70   : > { %p825_p3 = por %p824_p0, %p823_p1 }
  0x72   : > { %p826_p6 = pnand %p825_p3, %p819_p9 }
  0x74   : > { %829 = shalt.err (!%p826_p6)
}
  0x75   : > { %s830_s25 = scalar_lea.vmem %s1175_s28, 512  ;;  %s957_s2 = smov [#allocation10]  }
  0x76   : > { %p831_p8 = scmp.ne.s32.totalorder %s1175_s28, %s830_s25  ;;  %s835_s8 = sshll.u32 %s957_s2, 4  ;;  %s836_s8 = int_to_ptr.vmem [resolvable:$false] %s835_s8 }
  0x77   : > { %s837_s29 = scalar_lea.vmem %s836_s8, 1024  ;;  %p838_p5 = scmp.lt.s32.totalorder %s1175_s28, %s836_s8 }
  0x78   : > { %p833_p2 = pnand %p831_p8, %p1096_p10  ;;  %p839_p12 = scmp.lt.s32.totalorder %s837_s29, %s830_s25 }
  0x7a   : > { %p834_p4 = pneg %p833_p2  ;;  %p840_p11 = por %p839_p12, %p838_p5 }
  0x7c   : > { %p841_p13 = pnand %p840_p11, %p834_p4 }
  0x7e   : > { %844 = shalt.err (!%p841_p13)
}
  0x7f   : > { %678 = dma.hbm_to_vmem [thread:$0]  (!%p1075_p7), %s1172_s15, 512, %s1175_s28, %s1090_s9, %s1407_s18, %s1407_s18, %s1406_s10  }
  0x80   : > { %p1408_p10 = scmp.ne.s32.totalorder %s1405_s7, 0 }
  0x81   : > { %s1205_s11 = sand.u32 (!%p1408_p10), 1, %s941_s1   ;;  %p1409_p9 = scmp.ne.s32.totalorder (!%p1408_p10), %s1397_s20, 0 }
  0x82   : > { %250 = sbr.rel (%p1408_p10) target bundleno = 480 (0x1e0), region = 32  ;;  %s1208_s23 = sshll.u32 (!%p1408_p10), %s1205_s11, 5 }
  0x83   : > { %s253_s26 = scalar_lea.sflag (!%p1408_p10), [#allocation6], %s1205_s11  ;;  %s1212_s3 = scalar_lea.vmem (!%p1408_p10), [#allocation5], %s1208_s23 }
  0x89   : > { %920 = dma.done.wait (%p1409_p9), %s253_s26, 512  }
  0x8a   : > { %922 = vsyncadd (%p1409_p9), %s253_s26, 4294966784  ;;  %s261_s9 = sand.u32 1, %s1034_s14   ;;  %s265_s10 = scalar_lea.vmem [#allocation8], %s1208_s23 }
  0x8b   : > { %s262_s7 = scalar_lea.sflag [#allocation9], %s261_s9 }
  0x8c   : > { %924 = dma.done.wait (%p1409_p9), %s262_s7, 1024  }
  0x8d   : > { %926 = vsyncadd (%p1409_p9), %s262_s7, 4294966272  ;;  %s315_s18 = sld [smem:[#allocation4 + %s1034_s14]]  ;;  %vm328_vm0 = vcmask 261120   ;;  %s274_s28 = scalar_lea.vmem [#allocation10], %s1208_s23  ;;  %v320_v8 = vld [vmem:[%s265_s10] sm:$0xff]  ;;  %v321_v9 = vld [vmem:[%s265_s10 + $0x8] sm:$0xff] }
  0x8e   : > { %s314_s15 = sld [smem:[#allocation3 + %s1034_s14]]  ;;  %v324_v0 = vld [vmem:[%s274_s28] sm:$0xff]  ;;  %v325_v1 = vld [vmem:[%s274_s28 + $0x8] sm:$0xff]  ;;  %v326_v2 = vld [vmem:[%s274_s28 + $0x10] sm:$0xff]  ;;  %s958_s8 = smov 1e-06  }
  0x8f   : > { %v327_v4 = vld [vmem:[%s274_s28 + $0x18] sm:$0xff]  ;;  %v329_v5 = vsel %vm328_vm0, %v324_v0, 0.0  ;;  %v330_v6 = vsel %vm328_vm0, %v325_v1, 0.0  ;;  %v332_v7 = vsel %vm328_vm0, %v326_v2, 0.0  ;;  %v322_v12 = vld [vmem:[%s265_s10 + $0x10] sm:$0xff]  ;;  %v316_v16 = vld [vmem:[%s1212_s3] sm:$0xff] }
  0x90   : > { %v331_v11 = vadd.f32 %v330_v6, %v329_v5  ;;  %v323_v13 = vld [vmem:[%s265_s10 + $0x18] sm:$0xff]  ;;  %v334_v17 = vsel %vm328_vm0, %v327_v4, 0.0  ;;  %v317_v20 = vld [vmem:[%s1212_s3 + $0x8] sm:$0xff]  ;;  %v318_v21 = vld [vmem:[%s1212_s3 + $0x10] sm:$0xff]  ;;  %s306_s9 = scalar_lea.vmem [#allocation11], %s1208_s23  ;;  %s1280_s28 = scalar_lea.vmem [#allocation12], %s1208_s23 }
  0x91   : > { %v319_v22 = vld [vmem:[%s1212_s3 + $0x18] sm:$0xff]  ;;  %s649_s3 = sshll.u32 %s1034_s14, 9  ;;  %s456_s7 = sshll.u32 %s306_s9, 4  ;;  %s1277_s7 = int_to_ptr.vmem [resolvable:$true] %s456_s7 }
  0x92   : > { %v333_v24 = vadd.f32 %v332_v7, %v331_v11  ;;  %p1410_p0 = scmp.ne.s32.totalorder %s1398_s21, 0 }
  0x93   : > { %v352_v3 = vstv %s315_s18 }
  0x94   : > { %v347_v10 = vstv %s314_s15  ;;  %v1230_v14 = vsub.f32 %v320_v8, %v352_v3  ;;  %v1232_v15 = vsub.f32 %v321_v9, %v352_v3  ;;  %v1236_v18 = vsub.f32 %v322_v12, %v352_v3  ;;  %s1275_s15 = scalar_lea.hbm %s1386_s5, %s649_s3 }
  0x95   : > { %v1238_v19 = vsub.f32 %v323_v13, %v352_v3  ;;  %v1243_v23 = vsub.f32 %v316_v16, %v347_v10  ;;  %v1247_v27 = vsub.f32 %v317_v20, %v347_v10  ;;  %v1251_v30 = vsub.f32 %v318_v21, %v347_v10 }
  0x96   : > { %v387_v25 = vand.u32 2147483647, %v1230_v14  ;;  %v388_v26 = vand.u32 2147483647, %v1232_v15  ;;  %v389_v28 = vand.u32 2147483647, %v1236_v18  ;;  %v1253_v31 = vsub.f32 %v319_v22, %v347_v10 }
  0x97   : > { %v390_v29 = vand.u32 2147483647, %v1238_v19  ;;  %v335_v32 = vadd.f32 %v334_v17, %v333_v24  ;;  %v357_v35 = vand.u32 2147483647, %v1243_v23  ;;  %v358_v38 = vand.u32 2147483647, %v1247_v27 }
  0x98   : > { %v391_v33 = vmul.f32 %v387_v25, %v324_v0  ;;  %v392_v34 = vmul.f32 %v388_v26, %v325_v1  ;;  %v393_v36 = vmul.f32 %v389_v28, %v326_v2  ;;  %v359_v39 = vand.u32 2147483647, %v1251_v30 }
  0x99   : > { %v394_v37 = vmul.f32 %v390_v29, %v327_v4  ;;  %336 = vadd.xlane.f32.xlu0 %v335_v32  ;;  %v360_v42 = vand.u32 2147483647, %v1253_v31  ;;  %v361_v43 = vmul.f32 %v357_v35, %v324_v0  ;;  %v362_v46 = vmul.f32 %v358_v38, %v325_v1 }
  0x9a   : > { %v395_v40 = vsel %vm328_vm0, %v391_v33, 0.0  ;;  %v396_v41 = vsel %vm328_vm0, %v392_v34, 0.0  ;;  %v398_v45 = vsel %vm328_vm0, %v393_v36, 0.0  ;;  %v363_v48 = vmul.f32 %v359_v39, %v326_v2 }
  0x9b   : > { %v397_v44 = vadd.f32 %v396_v41, %v395_v40  ;;  %v400_v47 = vsel %vm328_vm0, %v394_v37, 0.0  ;;  %v364_v49 = vmul.f32 %v360_v42, %v327_v4  ;;  %v365_v50 = vsel %vm328_vm0, %v361_v43, 0.0 }
  0x9c   : > { %v366_v52 = vsel %vm328_vm0, %v362_v46, 0.0  ;;  %v368_v54 = vsel %vm328_vm0, %v363_v48, 0.0 }
  0x9d   : > { %v399_v51 = vadd.f32 %v398_v45, %v397_v44  ;;  %v367_v53 = vadd.f32 %v366_v52, %v365_v50  ;;  %v370_v56 = vsel %vm328_vm0, %v364_v49, 0.0 }
  0x9f   : > { %v401_v55 = vadd.f32 %v400_v47, %v399_v51  ;;  %v369_v57 = vadd.f32 %v368_v54, %v367_v53 }
  0xa1   : > { %402 = vadd.xlane.f32.xlu1 %v401_v55  ;;  %v371_v58 = vadd.f32 %v370_v56, %v369_v57 }
  0xa3   : > { %372 = vadd.xlane.f32.xlu0 %v371_v58 }
 0x126   : > { %v337_v59 = vpop.xlane.xlu0 %336 }
 0x127   : > { %v338_v60 = vrot.slane %v337_v59, 4 }
 0x129   : > { %v339_v61 = vadd.f32 %v338_v60, %v337_v59 }
 0x12b   : > { %v340_v62 = vrot.slane %v339_v61, 2 }
 0x12d   : > { %v341_v63 = vadd.f32 %v340_v62, %v339_v61 }
 0x12e   : > { %v403_v9 = vpop.xlane.xlu1 %402 }
 0x12f   : > { %v342_v0 = vrot.slane %v341_v63, 1  ;;  %v404_v10 = vrot.slane %v403_v9, 4 }
 0x130   : > { %v373_v1 = vpop.xlane.xlu0 %372 }
 0x131   : > { %v343_v2 = vadd.f32 %v342_v0, %v341_v63  ;;  %v374_v3 = vrot.slane %v373_v1, 4  ;;  %v405_v11 = vadd.f32 %v404_v10, %v403_v9 }
 0x133   : > { %651 = vpush %v343_v2  ;;  %v375_v4 = vadd.f32 %v374_v3, %v373_v1  ;;  %v406_v12 = vrot.slane %v405_v11, 2 }
 0x135   : > { %v376_v5 = vrot.slane %v375_v4, 2  ;;  %v407_v16 = vadd.f32 %v406_v12, %v405_v11 }
 0x137   : > { %v377_v6 = vadd.f32 %v376_v5, %v375_v4  ;;  %v408_v17 = vrot.slane %v407_v16, 1 }
 0x139   : > { %v378_v7 = vrot.slane %v377_v6, 1  ;;  %v409_v21 = vadd.f32 %v408_v17, %v407_v16 }
 0x13b   : > { %v379_v8 = vadd.f32 %v378_v7, %v377_v6 }
 0x13d   : > { %653 = vpush %v379_v8 }
 0x164   : > { %s652_s20 = spop %651 }
 0x165   : > { %p345_p7 = scmp.gt.f32.partialorder %s652_s20, 0.0 }
 0x167   : > { %s346_s27 = scalar_select %p345_p7, %s652_s20, 1.0 }
 0x168   : > { %s472_s20 = sshll.u32 %s1280_s28, 4  ;;  %s1300_s20 = int_to_ptr.vmem [resolvable:$true] %s472_s20 }
 0x169   : > { %v381_v13 = vstv %s346_s27  ;;  %s1298_s27 = scalar_lea.hbm %s1387_s6, %s649_s3 }
 0x16a   : > { %727 = vrcp.f32 %v381_v13 }
 0x16e   : > { %s654_s17 = spop %653 }
 0x174   : > { %v728_v20 = vpop.eup %727 }
 0x175   : > { %655 = vpush %v728_v20 }
 0x176   : > { %657 = vpush %v409_v21 }
 0x1a6   : > { %s656_s30 = spop %655 }
 0x1a7   : > { %s384_s24 = smul.f32 %s656_s30, %s654_s17  ;;  %s658_s25 = spop %657 }
 0x1a8   : > { %s414_s2 = smul.f32 %s658_s25, %s656_s30  ;;  %s438_s17 = scalar_lea.sflag [#allocation7], %s1205_s11 }
 0x1a9   : > { %s385_s29 = smax.f32 %s958_s8, %s384_s24  ;;  %s845_s30 = scalar_lea.vmem %s1277_s7, 512 }
 0x1aa   : > { %s1418_s29 = smov (!%p345_p7, %s385_s29), 1.0  ;;  %s415_s26 = smax.f32 %s958_s8, %s414_s2 }
 0x1ab   : > { %s1420_s26 = smov (!%p345_p7, %s415_s26), 1.0  ;;  %v417_v22 = vstv %s1418_s29  ;;  %p846_p1 = scmp.ne.s32.totalorder %s1277_s7, %s845_s30 }
 0x1ac   : > { %729 = vrcp.f32 %v417_v22  ;;  %v427_v24 = vstv %s1420_s26  ;;  %s959_s24 = smov [#allocation11]  }
 0x1ad   : > { %731 = vrcp.f32 %v427_v24  ;;  %p847_p3 = pnand %p846_p1, %p1410_p0  ;;  %s849_s25 = sshll.u32 %s959_s24, 4  ;;  %s850_s25 = int_to_ptr.vmem [resolvable:$false] %s849_s25 }
 0x1ae   : > { %s851_s2 = scalar_lea.vmem %s850_s25, 1024  ;;  %p852_p8 = scmp.lt.s32.totalorder %s1277_s7, %s850_s25 }
 0x1af   : > { %p848_p6 = pneg %p847_p3  ;;  %p853_p2 = scmp.lt.s32.totalorder %s851_s2, %s845_s30 }
 0x1b1   : > { %p854_p4 = por %p853_p2, %p852_p8 }
 0x1b3   : > { %p855_p5 = pnand %p854_p4, %p848_p6 }
 0x1b6   : > { %v730_v25 = vpop.eup %729 }
 0x1b7   : > { %v419_v26 = vmul.f32 %v730_v25, %v1243_v23  ;;  %v420_v28 = vmul.f32 %v730_v25, %v1247_v27  ;;  %v421_v29 = vmul.f32 %v730_v25, %v1251_v30  ;;  %v422_v32 = vmul.f32 %v730_v25, %v1253_v31  ;;  %v732_v33 = vpop.eup %731 }
 0x1b8   : > { %v429_v23 = vmul.f32 %v732_v33, %v1230_v14  ;;  %v430_v27 = vmul.f32 %v732_v33, %v1232_v15  ;;  %v431_v34 = vmul.f32 %v732_v33, %v1236_v18  ;;  %v432_v30 = vmul.f32 %v732_v33, %v1238_v19 }
 0x1b9   : > { %423 = vst.msk [vmem:[%s306_s9] sm:$0xff] %vm328_vm0, %v419_v26  ;;  %424 = vst.msk [vmem:[%s306_s9 + $0x8] sm:$0xff] %vm328_vm0, %v420_v28 }
 0x1ba   : > { %425 = vst.msk [vmem:[%s306_s9 + $0x10] sm:$0xff] %vm328_vm0, %v421_v29  ;;  %426 = vst.msk [vmem:[%s306_s9 + $0x18] sm:$0xff] %vm328_vm0, %v422_v32 }
 0x1bb   : > { %858 = shalt.err (!%p855_p5)
}
 0x1bc   : > { %s859_s8 = scalar_lea.hbm %s1275_s15, 512  ;;  %s863_s3 = scalar_lea.hbm %s1386_s5, 1024 }
 0x1bd   : > { %p860_p12 = scmp.ne.s32.totalorder %s1275_s15, %s859_s8  ;;  %p864_p10 = scmp.lt.u32.totalorder %s1275_s15, %s1386_s5 }
 0x1be   : > { %p865_p9 = scmp.lt.u32.totalorder %s863_s3, %s859_s8  ;;  %p867_p1 = scmp.lt.u32.totalorder %s859_s8, %s1275_s15 }
 0x1bf   : > { %p861_p11 = pnand %p860_p12, %p1410_p0 }
 0x1c0   : > { %p866_p7 = por %p865_p9, %p864_p10 }
 0x1c1   : > { %p862_p13 = pneg %p861_p11 }
 0x1c2   : > { %p868_p3 = por %p867_p1, %p866_p7 }
 0x1c4   : > { %p869_p6 = pnand %p868_p3, %p862_p13 }
 0x1c6   : > { %872 = shalt.err (!%p869_p6)
}
 0x1c7   : > { %s960_s18 = smov 128   ;;  %s961_s14 = smov 8   ;;  %433 = vst.msk [vmem:[%s1280_s28] sm:$0xff] %vm328_vm0, %v429_v23  ;;  %434 = vst.msk [vmem:[%s1280_s28 + $0x8] sm:$0xff] %vm328_vm0, %v430_v27 }
 0x1c8   : > { %665 = dma.vmem_to_hbm [thread:$0]  (%p1410_p0), %s1277_s7, 512, %s1275_s15, %s438_s17, %s960_s18, %s960_s18, %s961_s14  }
 0x1c9   : > { %435 = vst.msk [vmem:[%s1280_s28 + $0x10] sm:$0xff] %vm328_vm0, %v431_v34  ;;  %436 = vst.msk [vmem:[%s1280_s28 + $0x18] sm:$0xff] %vm328_vm0, %v432_v30  ;;  %s443_s23 = scalar_lea.sflag [#allocation13], %s1205_s11  ;;  %s873_s30 = scalar_lea.vmem %s1300_s20, 512 }
 0x1ca   : > { %p874_p8 = scmp.ne.s32.totalorder %s1300_s20, %s873_s30  ;;  %s962_s24 = smov [#allocation12]  }
 0x1cb   : > { %s877_s25 = sshll.u32 %s962_s24, 4  ;;  %s878_s25 = int_to_ptr.vmem [resolvable:$false] %s877_s25 }
 0x1cc   : > { %p875_p2 = pnand %p874_p8, %p1410_p0  ;;  %s879_s2 = scalar_lea.vmem %s878_s25, 1024 }
 0x1cd   : > { %p880_p5 = scmp.lt.s32.totalorder %s1300_s20, %s878_s25  ;;  %p881_p12 = scmp.lt.s32.totalorder %s879_s2, %s873_s30 }
 0x1ce   : > { %p876_p4 = pneg %p875_p2 }
 0x1cf   : > { %p882_p11 = por %p881_p12, %p880_p5 }
 0x1d1   : > { %p883_p13 = pnand %p882_p11, %p876_p4 }
 0x1d3   : > { %886 = shalt.err (!%p883_p13)
}
 0x1d4   : > { %s887_s7 = scalar_lea.hbm %s1298_s27, 512  ;;  %s891_s17 = scalar_lea.hbm %s1387_s6, 1024 }
 0x1d5   : > { %p888_p10 = scmp.ne.s32.totalorder %s1298_s27, %s887_s7  ;;  %p892_p1 = scmp.lt.u32.totalorder %s1298_s27, %s1387_s6 }
 0x1d6   : > { %p893_p3 = scmp.lt.u32.totalorder %s891_s17, %s887_s7  ;;  %p895_p8 = scmp.lt.u32.totalorder %s887_s7, %s1298_s27 }
 0x1d7   : > { %p889_p9 = pnand %p888_p10, %p1410_p0 }
 0x1d8   : > { %p894_p6 = por %p893_p3, %p892_p1 }
 0x1d9   : > { %p890_p7 = pneg %p889_p9 }
 0x1da   : > { %p896_p2 = por %p895_p8, %p894_p6 }
 0x1dc   : > { %p897_p4 = pnand %p896_p2, %p890_p7 }
 0x1de   : > { %900 = shalt.err (!%p897_p4)
}
 0x1df   : > { %666 = dma.vmem_to_hbm [thread:$0]  (%p1410_p0), %s1300_s20, 512, %s1298_s27, %s443_s23, %s960_s18, %s960_s18, %s961_s14  }
 0x1e0 PF: > { %s487_s26 = sand.u32 1, %s937_s0   ;;  %p1411_p5 = scmp.ne.s32.totalorder %s1399_s22, 0 }
 0x1e1   : > { %p1412_p12 = scmp.ge.s32.totalorder %s949_s13, 2  ;;  %s488_s3 = scalar_lea.sflag [#allocation7], %s487_s26 }
 0x1e3   : > { %p680_p11 = pnand %p1412_p12, %p1411_p5 }
 0x1e5   : > { %928 = dma.done.wait (!%p680_p11), %s488_s3, 512  }
 0x1e6   : > { %930 = vsyncadd (!%p680_p11), %s488_s3, 4294966784  ;;  %s497_s21 = scalar_lea.sflag [#allocation13], %s487_s26 }
 0x1e7   : > { %932 = dma.done.wait (!%p680_p11), %s497_s21, 512  }
 0x1e8   : > { %934 = vsyncadd (!%p680_p11), %s497_s21, 4294966784  ;;  %p34_p0 = scmp.ge.s32.totalorder %s1038_s16, 4   ;;  %s1413_s0 = smov %s941_s1 }
 0x1e9   : > { %s1414_s1 = smov %s945_s12  ;;  %s1415_s12 = smov %s1050_s19 }
 0x1ea   : > { %s1416_s13 = smov %s1038_s16  ;;  %36 = sbr.rel (!%p34_p0) target bundleno = 32 (0x20), region = 118 }
 0x1f1   :  { %502 = vsyncpa [#allocation6], 1 }
 0x1f2   :  { %504 = vsyncpa [#allocation6 + $0x1], 1 }
 0x1f3   :  { %505 = vsyncpa [#allocation9], 1 }
 0x1f4   :  { %507 = vsyncpa [#allocation9 + $0x1], 1 }
 0x1f5   :  { %508 = vsyncpa [#allocation7], 1 }
 0x1f6   :  { %510 = vsyncpa [#allocation7 + $0x1], 1 }
 0x1f7   :  { %511 = vsyncpa [#allocation13], 1 }
 0x1f8   :  { %513 = vsyncpa [#allocation13 + $0x1], 1 }

</bundles_post_ra>
